<compile_context>
chip_gen: v7x
topology: tpu7x:2x2x1
jax: 0.10.0
libtpu: 0.0.40
codegen_flags: <defaults>
</compile_context>

<pallas_src>
import functools

import jax
import jax.numpy as jnp
from jax.experimental import pallas as pl
from jax.experimental.pallas import tpu as pltpu


def _double_conv_kernel(x_ref, b1_ref, b2_ref, s1_ref, t1_ref, s2_ref, t2_ref,
                        o_ref, hpad_ref, *, H, Nb):
    """Fused (conv3x3 + BN + ReLU) x 2 for Nb batch elements.

    x_ref:    (Nb, H+2, W*Cin)    bf16  row-padded (per image), lane-flattened NHWC
    b1_ref:   (3, W*Cin,  W*Cmid) bf16  block-banded conv1 weights (per row tap)
    b2_ref:   (3, W*Cmid, W*Cout) bf16  block-banded conv2 weights (per row tap)
    s*/t*:    (1, W*C)            f32   folded BN scale / shift, tiled over W
    o_ref:    (Nb, H, W*Cout)     f32   lane-dense output
    hpad_ref: (Nb, H+32, W*Cmid)  bf16  VMEM scratch; interior rows [16, 16+H)
    """
    WCin = x_ref.shape[2]
    WCmid = b1_ref.shape[2]
    WCout = b2_ref.shape[2]
    M = Nb * H

    # ---- stage 1: conv1 as 3 banded MXU matmuls over row shifts, + BN + ReLU ----
    def lhs1(k):  # k = dy + 1; rows are pre-padded by 1 per image -> stays in-image
        return x_ref[:, k:k + H, :].reshape(M, WCin)

    acc1 = jnp.dot(lhs1(0), b1_ref[0], preferred_element_type=jnp.float32)
    acc1 = acc1 + jnp.dot(lhs1(1), b1_ref[1], preferred_element_type=jnp.float32)
    acc1 = acc1 + jnp.dot(lhs1(2), b1_ref[2], preferred_element_type=jnp.float32)
    h = jnp.maximum(acc1 * s1_ref[...] + t1_ref[...], 0.0)      # (M, W*Cmid) f32
    # Dropout(p=0.5): identity in eval mode.

    # ---- stage 2 staging: zero ONLY the halo blocks, store interior once (bf16) ----
    hpad_ref[:, 0:16, :] = jnp.zeros((Nb, 16, WCmid), hpad_ref.dtype)
    hpad_ref[:, 16 + H:32 + H, :] = jnp.zeros((Nb, 16, WCmid), hpad_ref.dtype)
    hpad_ref[:, 16:16 + H, :] = h.reshape(Nb, H, WCmid).astype(hpad_ref.dtype)

    def lhs2(k):
        return hpad_ref[:, 15 + k:15 + k + H, :].reshape(M, WCmid)

    acc2 = jnp.dot(lhs2(0), b2_ref[0], preferred_element_type=jnp.float32)
    acc2 = acc2 + jnp.dot(lhs2(1), b2_ref[1], preferred_element_type=jnp.float32)
    acc2 = acc2 + jnp.dot(lhs2(2), b2_ref[2], preferred_element_type=jnp.float32)
    y = jnp.maximum(acc2 * s2_ref[...] + t2_ref[...], 0.0)      # (M, W*Cout) f32
    # Dropout(p=0.5): identity in eval mode.

    o_ref[...] = y.reshape(Nb, H, WCout).astype(o_ref.dtype)


def _pick_batch_block(N, H, target_m=256):
    """Largest divisor Nb of N with Nb*H <= target_m (>=1)."""
    nb = max(1, min(N, target_m // max(H, 1)))
    while N % nb != 0:
        nb -= 1
    return nb


def double_conv_fused(x_rows_padded, B1, B2, s1, t1, s2, t2):
    """x_rows_padded: (N, H+2, W*Cin) bf16; B1/B2: banded bf16 weights;
    s*/t*: (1, W*C) f32.  Returns (N, H, W*Cout) f32."""
    N, Hp2, WCin = x_rows_padded.shape
    H = Hp2 - 2
    WCmid = B1.shape[2]
    WCout = B2.shape[2]
    Nb = _pick_batch_block(N, H)

    kernel = functools.partial(_double_conv_kernel, H=H, Nb=Nb)

    flops = 2 * N * H * 3 * (WCin * WCmid + WCmid * WCout)
    bytes_accessed = (x_rows_padded.size * 2 + B1.size * 2 + B2.size * 2
                      + (s1.size + t1.size + s2.size + t2.size) * 4
                      + N * H * WCout * 4)

    return pl.pallas_call(
        kernel,
        out_shape=jax.ShapeDtypeStruct((N, H, WCout), jnp.float32),
        grid=(N // Nb,),
        in_specs=[
            pl.BlockSpec((Nb, Hp2, WCin), lambda n: (n, 0, 0)),
            pl.BlockSpec((3, WCin, WCmid), lambda n: (0, 0, 0)),
            pl.BlockSpec((3, WCmid, WCout), lambda n: (0, 0, 0)),
            pl.BlockSpec((1, WCmid), lambda n: (0, 0)),
            pl.BlockSpec((1, WCmid), lambda n: (0, 0)),
            pl.BlockSpec((1, WCout), lambda n: (0, 0)),
            pl.BlockSpec((1, WCout), lambda n: (0, 0)),
        ],
        out_specs=pl.BlockSpec((Nb, H, WCout), lambda n: (n, 0, 0)),
        scratch_shapes=[pltpu.VMEM((Nb, H + 32, WCmid), jnp.bfloat16)],
        compiler_params=pltpu.CompilerParams(
            dimension_semantics=("parallel",)),
        cost_estimate=pl.CostEstimate(
            flops=flops, transcendentals=0, bytes_accessed=bytes_accessed),
    )(x_rows_padded, B1, B2, s1, t1, s2, t2)


def _build_banded_weights(w_k, W):
    """w_k: (3, 3, Cin, Cout) -> (3, W*Cin, W*Cout) block-banded matrices B[ky] with
    B[ky][w_in*Cin + c, w_out*Cout + o] = w_k[ky, w_in - w_out + 1, c, o]
    for |w_in - w_out| <= 1, else 0 (encodes kx taps AND width zero-padding)."""
    _, _, Cin, Cout = w_k.shape
    diff = jnp.arange(W)[:, None] - jnp.arange(W)[None, :]     # w_in - w_out
    valid = (jnp.abs(diff) <= 1).astype(w_k.dtype)             # (W, W)
    kx = jnp.clip(diff + 1, 0, 2)                              # (W, W)
    band = w_k[:, kx, :, :]                                    # (3, W, W, Cin, Cout)
    band = band * valid[None, :, :, None, None]
    band = jnp.transpose(band, (0, 1, 3, 2, 4))                # (3, w_in, Cin, w_out, Cout)
    return band.reshape(3, W * Cin, W * Cout)


def _fold_bn(conv_bias, gamma, beta, running_mean, running_var, eps=1e-5):
    scale = gamma / jnp.sqrt(running_var + eps)
    shift = (conv_bias - running_mean) * scale + beta
    return scale, shift


def init_double_conv_params(key, in_channels, out_channels, mid_channels=None):
    """Deterministic synthetic parameters (shapes match the nn.Module)."""
    if mid_channels is None:
        mid_channels = out_channels
    keys = jax.random.split(key, 8)

    def conv_params(kw, kb, cin, cout):
        fan_in = cin * 9
        bound = 1.0 / jnp.sqrt(fan_in)
        w = jax.random.uniform(kw, (cout, cin, 3, 3), jnp.float32, -bound, bound)
        b = jax.random.uniform(kb, (cout,), jnp.float32, -bound, bound)
        return w, b

    w1, b1 = conv_params(keys[0], keys[1], in_channels, mid_channels)
    w2, b2 = conv_params(keys[2], keys[3], mid_channels, out_channels)

    def bn_params(k, c):
        ks = jax.random.split(k, 2)
        gamma = jnp.ones((c,), jnp.float32)
        beta = jnp.zeros((c,), jnp.float32)
        running_mean = 0.1 * jax.random.normal(ks[0], (c,), jnp.float32)
        running_var = 1.0 + 0.1 * jax.random.uniform(ks[1], (c,), jnp.float32)
        return gamma, beta, running_mean, running_var

    bn1 = bn_params(keys[4], mid_channels)
    bn2 = bn_params(keys[5], out_channels)
    return (w1, b1, bn1), (w2, b2, bn2)


def double_conv_forward(x_nchw, params):
    """Forward pass matching DoubleConv (eval mode). Input/Output: NCHW."""
    (w1, b1, bn1), (w2, b2, bn2) = params
    N, Cin, H, W = x_nchw.shape
    Cmid = w1.shape[0]
    Cout = w2.shape[0]

    # NCHW -> NHWC -> lane-flattened rows (N, H, W*Cin) in bf16; pad only the H axis
    # by 1 per image (the kx / width padding is folded into the banded weights).
    x = jnp.transpose(x_nchw, (0, 2, 3, 1)).reshape(N, H, W * Cin)
    x = x.astype(jnp.bfloat16)
    x = jnp.pad(x, ((0, 0), (1, 1), (0, 0)))

    # (Cout, Cin, 3, 3) -> (ky, kx, Cin, Cout) -> banded (3, W*Cin, W*Cout) bf16.
    w1_k = jnp.transpose(w1, (2, 3, 1, 0))
    w2_k = jnp.transpose(w2, (2, 3, 1, 0))
    B1 = _build_banded_weights(w1_k, W).astype(jnp.bfloat16)
    B2 = _build_banded_weights(w2_k, W).astype(jnp.bfloat16)

    s1, t1 = _fold_bn(b1, *bn1)
    s2, t2 = _fold_bn(b2, *bn2)
    s1f = jnp.tile(s1, W).reshape(1, W * Cmid).astype(jnp.float32)
    t1f = jnp.tile(t1, W).reshape(1, W * Cmid).astype(jnp.float32)
    s2f = jnp.tile(s2, W).reshape(1, W * Cout).astype(jnp.float32)
    t2f = jnp.tile(t2, W).reshape(1, W * Cout).astype(jnp.float32)

    y = double_conv_fused(x, B1, B2, s1f, t1f, s2f, t2f)    # (N, H, W*Cout)
    y = y.reshape(N, H, W, Cout)
    return jnp.transpose(y, (0, 3, 1, 2))                   # NCHW


def _reference_forward(x_nchw, params):
    """Pure-JAX (XLA) reference with the same bf16 MXU-operand rounding as the kernel."""
    (w1, b1, bn1), (w2, b2, bn2) = params

    def q(a):  # bf16 round-trip: what the kernel feeds the MXU
        return a.astype(jnp.bfloat16).astype(jnp.float32)

    def block(x, w, b, bn):
        y = jax.lax.conv_general_dilated(
            q(x), q(w), window_strides=(1, 1), padding=((1, 1), (1, 1)),
            dimension_numbers=("NCHW", "OIHW", "NCHW"),
            preferred_element_type=jnp.float32)
        gamma, beta, mean, var = bn
        y = y + b[None, :, None, None]
        y = gamma[None, :, None, None] * (y - mean[None, :, None, None]) \
            / jnp.sqrt(var[None, :, None, None] + 1e-5) + beta[None, :, None, None]
        return jnp.maximum(y, 0.0)

    h = block(x_nchw.astype(jnp.float32), w1, b1, bn1)
    return block(h, w2, b2, bn2)


if __name__ == "__main__":
    key = jax.random.PRNGKey(0)
    k_param, k_x = jax.random.split(key)

    in_channels, out_channels = 4, 8
    N, H, W = 2, 16, 16

    params = init_double_conv_params(k_param, in_channels, out_channels)
    x = jax.random.normal(k_x, (N, in_channels, H, W), jnp.float32)

    out = jax.block_until_ready(double_conv_forward(x, params))
    ref = jax.block_until_ready(_reference_forward(x, params))

    assert out.shape == (N, out_channels, H, W), out.shape
    assert jnp.allclose(out, ref, atol=2e-3, rtol=2e-3), \
        float(jnp.max(jnp.abs(out - ref)))

    print("KERNEL_OK")
</pallas_src>

<mosaic_0001>
module attributes {stable_mosaic.version = 11 : i64} {
  func.func @_double_conv_kernel(%arg0: i32, %arg1: memref<2x18x64xbf16, #tpu.memory_space<vmem>>, %arg2: memref<3x64x128xbf16, #tpu.memory_space<vmem>>, %arg3: memref<3x128x128xbf16, #tpu.memory_space<vmem>>, %arg4: memref<1x128xf32, #tpu.memory_space<vmem>>, %arg5: memref<1x128xf32, #tpu.memory_space<vmem>>, %arg6: memref<1x128xf32, #tpu.memory_space<vmem>>, %arg7: memref<1x128xf32, #tpu.memory_space<vmem>>, %arg8: memref<2x16x128xf32, #tpu.memory_space<vmem>>, %arg9: memref<2x48x128xbf16, #tpu.memory_space<vmem>>) attributes {dimension_semantics = [#tpu.dimension_semantics<parallel>], iteration_bounds = array<i64: 1>, scalar_prefetch = 0 : i64, scratch_operands = 1 : i64, tpu.core_type = #tpu.core_type<tc>, window_params = [{transform_indices = @transform_0, window_bounds = array<i64: 2, 18, 64>}, {pipeline_mode = #tpu.pipeline_mode<synchronous>, transform_indices = @transform_1, window_bounds = array<i64: 3, 64, 128>}, {pipeline_mode = #tpu.pipeline_mode<synchronous>, transform_indices = @transform_2, window_bounds = array<i64: 3, 128, 128>}, {pipeline_mode = #tpu.pipeline_mode<synchronous>, transform_indices = @transform_3, window_bounds = array<i64: 1, 128>}, {pipeline_mode = #tpu.pipeline_mode<synchronous>, transform_indices = @transform_4, window_bounds = array<i64: 1, 128>}, {pipeline_mode = #tpu.pipeline_mode<synchronous>, transform_indices = @transform_5, window_bounds = array<i64: 1, 128>}, {pipeline_mode = #tpu.pipeline_mode<synchronous>, transform_indices = @transform_6, window_bounds = array<i64: 1, 128>}, {transform_indices = @transform_7, window_bounds = array<i64: 2, 16, 128>}]} {
    %c0 = arith.constant 0 : index
    %c0_0 = arith.constant 0 : index
    %c0_1 = arith.constant 0 : index
    %0 = vector.load %arg1[%c0, %c0_0, %c0_1] : memref<2x18x64xbf16, #tpu.memory_space<vmem>>, vector<2x16x64xbf16>
    %1 = vector.shape_cast %0 : vector<2x16x64xbf16> to vector<32x64xbf16>
    %c0_2 = arith.constant 0 : index
    %c0_3 = arith.constant 0 : index
    %c0_4 = arith.constant 0 : index
    %2 = vector.load %arg2[%c0_2, %c0_3, %c0_4] : memref<3x64x128xbf16, #tpu.memory_space<vmem>>, vector<1x64x128xbf16>
    %3 = vector.shape_cast %2 : vector<1x64x128xbf16> to vector<64x128xbf16>
    %cst = arith.constant dense<0.000000e+00> : vector<32x128xf32>
    %4 = tpu.matmul %1, %3, %cst {dimension_numbers = #tpu.dot_dimension_numbers<[1], [0], [0], [1], [0, 0, 1, 1], [], []>} : vector<32x64xbf16>, vector<64x128xbf16>, vector<32x128xf32> -> vector<32x128xf32>
    %c0_5 = arith.constant 0 : index
    %c1 = arith.constant 1 : index
    %c0_6 = arith.constant 0 : index
    %5 = vector.load %arg1[%c0_5, %c1, %c0_6] : memref<2x18x64xbf16, #tpu.memory_space<vmem>>, vector<2x16x64xbf16>
    %6 = vector.shape_cast %5 : vector<2x16x64xbf16> to vector<32x64xbf16>
    %c1_7 = arith.constant 1 : index
    %c0_8 = arith.constant 0 : index
    %c0_9 = arith.constant 0 : index
    %7 = vector.load %arg2[%c1_7, %c0_8, %c0_9] : memref<3x64x128xbf16, #tpu.memory_space<vmem>>, vector<1x64x128xbf16>
    %8 = vector.shape_cast %7 : vector<1x64x128xbf16> to vector<64x128xbf16>
    %cst_10 = arith.constant dense<0.000000e+00> : vector<32x128xf32>
    %9 = tpu.matmul %6, %8, %cst_10 {dimension_numbers = #tpu.dot_dimension_numbers<[1], [0], [0], [1], [0, 0, 1, 1], [], []>} : vector<32x64xbf16>, vector<64x128xbf16>, vector<32x128xf32> -> vector<32x128xf32>
    %10 = arith.addf %4, %9 : vector<32x128xf32>
    %c0_11 = arith.constant 0 : index
    %c2 = arith.constant 2 : index
    %c0_12 = arith.constant 0 : index
    %11 = vector.load %arg1[%c0_11, %c2, %c0_12] : memref<2x18x64xbf16, #tpu.memory_space<vmem>>, vector<2x16x64xbf16>
    %12 = vector.shape_cast %11 : vector<2x16x64xbf16> to vector<32x64xbf16>
    %c2_13 = arith.constant 2 : index
    %c0_14 = arith.constant 0 : index
    %c0_15 = arith.constant 0 : index
    %13 = vector.load %arg2[%c2_13, %c0_14, %c0_15] : memref<3x64x128xbf16, #tpu.memory_space<vmem>>, vector<1x64x128xbf16>
    %14 = vector.shape_cast %13 : vector<1x64x128xbf16> to vector<64x128xbf16>
    %cst_16 = arith.constant dense<0.000000e+00> : vector<32x128xf32>
    %15 = tpu.matmul %12, %14, %cst_16 {dimension_numbers = #tpu.dot_dimension_numbers<[1], [0], [0], [1], [0, 0, 1, 1], [], []>} : vector<32x64xbf16>, vector<64x128xbf16>, vector<32x128xf32> -> vector<32x128xf32>
    %16 = arith.addf %10, %15 : vector<32x128xf32>
    %c0_17 = arith.constant 0 : index
    %c0_18 = arith.constant 0 : index
    %17 = vector.load %arg4[%c0_17, %c0_18] : memref<1x128xf32, #tpu.memory_space<vmem>>, vector<1x128xf32>
    %18 = vector.broadcast %17 : vector<1x128xf32> to vector<32x128xf32>
    %19 = arith.mulf %16, %18 : vector<32x128xf32>
    %c0_19 = arith.constant 0 : index
    %c0_20 = arith.constant 0 : index
    %20 = vector.load %arg5[%c0_19, %c0_20] : memref<1x128xf32, #tpu.memory_space<vmem>>, vector<1x128xf32>
    %21 = vector.broadcast %20 : vector<1x128xf32> to vector<32x128xf32>
    %22 = arith.addf %19, %21 : vector<32x128xf32>
    %cst_21 = arith.constant 0.000000e+00 : f32
    %23 = vector.broadcast %cst_21 : f32 to vector<32x128xf32>
    %24 = arith.maximumf %22, %23 : vector<32x128xf32>
    %cst_22 = arith.constant 0.000000e+00 : bf16
    %25 = vector.broadcast %cst_22 : bf16 to vector<2x16x128xbf16>
    %c0_23 = arith.constant 0 : index
    %c0_24 = arith.constant 0 : index
    %c0_25 = arith.constant 0 : index
    %26 = vector.load %arg9[%c0_23, %c0_24, %c0_25] : memref<2x48x128xbf16, #tpu.memory_space<vmem>>, vector<2x16x128xbf16>
    tpu.vector_store %arg9[%c0_23, %c0_24, %c0_25], %25 {strides = array<i32>} : memref<2x48x128xbf16, #tpu.memory_space<vmem>>, vector<2x16x128xbf16>,
    %cst_26 = arith.constant 0.000000e+00 : bf16
    %27 = vector.broadcast %cst_26 : bf16 to vector<2x16x128xbf16>
    %c0_27 = arith.constant 0 : index
    %c32 = arith.constant 32 : index
    %c0_28 = arith.constant 0 : index
    %28 = vector.load %arg9[%c0_27, %c32, %c0_28] : memref<2x48x128xbf16, #tpu.memory_space<vmem>>, vector<2x16x128xbf16>
    tpu.vector_store %arg9[%c0_27, %c32, %c0_28], %27 {strides = array<i32>} : memref<2x48x128xbf16, #tpu.memory_space<vmem>>, vector<2x16x128xbf16>,
    %29 = vector.shape_cast %24 : vector<32x128xf32> to vector<2x16x128xf32>
    %30 = arith.truncf %29 : vector<2x16x128xf32> to vector<2x16x128xbf16>
    %c0_29 = arith.constant 0 : index
    %c16 = arith.constant 16 : index
    %c0_30 = arith.constant 0 : index
    %31 = vector.load %arg9[%c0_29, %c16, %c0_30] : memref<2x48x128xbf16, #tpu.memory_space<vmem>>, vector<2x16x128xbf16>
    tpu.vector_store %arg9[%c0_29, %c16, %c0_30], %30 {strides = array<i32>} : memref<2x48x128xbf16, #tpu.memory_space<vmem>>, vector<2x16x128xbf16>,
    %c0_31 = arith.constant 0 : index
    %c15 = arith.constant 15 : index
    %c0_32 = arith.constant 0 : index
    %32 = vector.load %arg9[%c0_31, %c15, %c0_32] : memref<2x48x128xbf16, #tpu.memory_space<vmem>>, vector<2x16x128xbf16>
    %33 = vector.shape_cast %32 : vector<2x16x128xbf16> to vector<32x128xbf16>
    %c0_33 = arith.constant 0 : index
    %c0_34 = arith.constant 0 : index
    %c0_35 = arith.constant 0 : index
    %34 = vector.load %arg3[%c0_33, %c0_34, %c0_35] : memref<3x128x128xbf16, #tpu.memory_space<vmem>>, vector<1x128x128xbf16>
    %35 = vector.shape_cast %34 : vector<1x128x128xbf16> to vector<128x128xbf16>
    %cst_36 = arith.constant dense<0.000000e+00> : vector<32x128xf32>
    %36 = tpu.matmul %33, %35, %cst_36 {dimension_numbers = #tpu.dot_dimension_numbers<[1], [0], [0], [1], [0, 0, 1, 1], [], []>} : vector<32x128xbf16>, vector<128x128xbf16>, vector<32x128xf32> -> vector<32x128xf32>
    %c0_37 = arith.constant 0 : index
    %c16_38 = arith.constant 16 : index
    %c0_39 = arith.constant 0 : index
    %37 = vector.load %arg9[%c0_37, %c16_38, %c0_39] : memref<2x48x128xbf16, #tpu.memory_space<vmem>>, vector<2x16x128xbf16>
    %38 = vector.shape_cast %37 : vector<2x16x128xbf16> to vector<32x128xbf16>
    %c1_40 = arith.constant 1 : index
    %c0_41 = arith.constant 0 : index
    %c0_42 = arith.constant 0 : index
    %39 = vector.load %arg3[%c1_40, %c0_41, %c0_42] : memref<3x128x128xbf16, #tpu.memory_space<vmem>>, vector<1x128x128xbf16>
    %40 = vector.shape_cast %39 : vector<1x128x128xbf16> to vector<128x128xbf16>
    %cst_43 = arith.constant dense<0.000000e+00> : vector<32x128xf32>
    %41 = tpu.matmul %38, %40, %cst_43 {dimension_numbers = #tpu.dot_dimension_numbers<[1], [0], [0], [1], [0, 0, 1, 1], [], []>} : vector<32x128xbf16>, vector<128x128xbf16>, vector<32x128xf32> -> vector<32x128xf32>
    %42 = arith.addf %36, %41 : vector<32x128xf32>
    %c0_44 = arith.constant 0 : index
    %c17 = arith.constant 17 : index
    %c0_45 = arith.constant 0 : index
    %43 = vector.load %arg9[%c0_44, %c17, %c0_45] : memref<2x48x128xbf16, #tpu.memory_space<vmem>>, vector<2x16x128xbf16>
    %44 = vector.shape_cast %43 : vector<2x16x128xbf16> to vector<32x128xbf16>
    %c2_46 = arith.constant 2 : index
    %c0_47 = arith.constant 0 : index
    %c0_48 = arith.constant 0 : index
    %45 = vector.load %arg3[%c2_46, %c0_47, %c0_48] : memref<3x128x128xbf16, #tpu.memory_space<vmem>>, vector<1x128x128xbf16>
    %46 = vector.shape_cast %45 : vector<1x128x128xbf16> to vector<128x128xbf16>
    %cst_49 = arith.constant dense<0.000000e+00> : vector<32x128xf32>
    %47 = tpu.matmul %44, %46, %cst_49 {dimension_numbers = #tpu.dot_dimension_numbers<[1], [0], [0], [1], [0, 0, 1, 1], [], []>} : vector<32x128xbf16>, vector<128x128xbf16>, vector<32x128xf32> -> vector<32x128xf32>
    %48 = arith.addf %42, %47 : vector<32x128xf32>
    %c0_50 = arith.constant 0 : index
    %c0_51 = arith.constant 0 : index
    %49 = vector.load %arg6[%c0_50, %c0_51] : memref<1x128xf32, #tpu.memory_space<vmem>>, vector<1x128xf32>
    %50 = vector.broadcast %49 : vector<1x128xf32> to vector<32x128xf32>
    %51 = arith.mulf %48, %50 : vector<32x128xf32>
    %c0_52 = arith.constant 0 : index
    %c0_53 = arith.constant 0 : index
    %52 = vector.load %arg7[%c0_52, %c0_53] : memref<1x128xf32, #tpu.memory_space<vmem>>, vector<1x128xf32>
    %53 = vector.broadcast %52 : vector<1x128xf32> to vector<32x128xf32>
    %54 = arith.addf %51, %53 : vector<32x128xf32>
    %cst_54 = arith.constant 0.000000e+00 : f32
    %55 = vector.broadcast %cst_54 : f32 to vector<32x128xf32>
    %56 = arith.maximumf %54, %55 : vector<32x128xf32>
    %57 = vector.shape_cast %56 : vector<32x128xf32> to vector<2x16x128xf32>
    %c0_55 = arith.constant 0 : index
    %c0_56 = arith.constant 0 : index
    %c0_57 = arith.constant 0 : index
    %58 = vector.load %arg8[%c0_55, %c0_56, %c0_57] : memref<2x16x128xf32, #tpu.memory_space<vmem>>, vector<2x16x128xf32>
    tpu.vector_store %arg8[%c0_55, %c0_56, %c0_57], %57 {strides = array<i32>} : memref<2x16x128xf32, #tpu.memory_space<vmem>>, vector<2x16x128xf32>,
    return
  }
  func.func @transform_0(%arg0: i32) -> (i32, i32, i32) {
    %c0_i32 = arith.constant 0 : i32
    %c0_i32_0 = arith.constant 0 : i32
    %c0_i32_1 = arith.constant 0 : i32
    return %arg0, %c0_i32, %c0_i32_0 : i32, i32, i32
  }
  func.func @transform_1(%arg0: i32) -> (i32, i32, i32) {
    %c0_i32 = arith.constant 0 : i32
    %c0_i32_0 = arith.constant 0 : i32
    %c0_i32_1 = arith.constant 0 : i32
    %c0_i32_2 = arith.constant 0 : i32
    return %c0_i32, %c0_i32_0, %c0_i32_1 : i32, i32, i32
  }
  func.func @transform_2(%arg0: i32) -> (i32, i32, i32) {
    %c0_i32 = arith.constant 0 : i32
    %c0_i32_0 = arith.constant 0 : i32
    %c0_i32_1 = arith.constant 0 : i32
    %c0_i32_2 = arith.constant 0 : i32
    return %c0_i32, %c0_i32_0, %c0_i32_1 : i32, i32, i32
  }
  func.func @transform_3(%arg0: i32) -> (i32, i32) {
    %c0_i32 = arith.constant 0 : i32
    %c0_i32_0 = arith.constant 0 : i32
    %c0_i32_1 = arith.constant 0 : i32
    return %c0_i32, %c0_i32_0 : i32, i32
  }
  func.func @transform_4(%arg0: i32) -> (i32, i32) {
    %c0_i32 = arith.constant 0 : i32
    %c0_i32_0 = arith.constant 0 : i32
    %c0_i32_1 = arith.constant 0 : i32
    return %c0_i32, %c0_i32_0 : i32, i32
  }
  func.func @transform_5(%arg0: i32) -> (i32, i32) {
    %c0_i32 = arith.constant 0 : i32
    %c0_i32_0 = arith.constant 0 : i32
    %c0_i32_1 = arith.constant 0 : i32
    return %c0_i32, %c0_i32_0 : i32, i32
  }
  func.func @transform_6(%arg0: i32) -> (i32, i32) {
    %c0_i32 = arith.constant 0 : i32
    %c0_i32_0 = arith.constant 0 : i32
    %c0_i32_1 = arith.constant 0 : i32
    return %c0_i32, %c0_i32_0 : i32, i32
  }
  func.func @transform_7(%arg0: i32) -> (i32, i32, i32) {
    %c0_i32 = arith.constant 0 : i32
    %c0_i32_0 = arith.constant 0 : i32
    %c0_i32_1 = arith.constant 0 : i32
    return %arg0, %c0_i32, %c0_i32_0 : i32, i32, i32
  }
}

</mosaic_0001>

<bundles_post_ra>
// kernel: tpu_custom_call.1
= control target key start
LH: loop header
LB: loop body
LE: loop exit
PB: predicated region body
PF: predicated region fallthrough
CT: control target
= control target key end

     0   :  { %12 = vsyncpa [#allocation4], 0  ;;  %s1431_s0 = inlined_call_operand.vmem [shape: bf16[2,18,64], index: 0, kind: input, shape index: {}]   ;;  %s1432_s1 = inlined_call_operand.hbm [shape: bf16[3,64,128], index: 1, kind: input, shape index: {}]   ;;  %s1433_s2 = inlined_call_operand.hbm [shape: bf16[3,128,128], index: 2, kind: input, shape index: {}]   ;;  %s1434_s3 = inlined_call_operand.vmem [shape: f32[1,128], index: 3, kind: input, shape index: {}]   ;;  %s1435_s4 = inlined_call_operand.vmem [shape: f32[1,128], index: 4, kind: input, shape index: {}]   ;;  %s1436_s5 = inlined_call_operand.vmem [shape: f32[1,128], index: 5, kind: input, shape index: {}]   ;;  %s1437_s6 = inlined_call_operand.vmem [shape: f32[1,128], index: 6, kind: input, shape index: {}]   ;;  %s1438_s7 = inlined_call_operand.hbm [shape: f32[2,16,128], index: 7, kind: output, shape index: {}]  }
   0x1   :  { %13 = vsyncpa [#allocation7], 0 }
   0x2   :  { %14 = vsyncpa [#allocation5], 0  ;;  %s1247_s24 = smov [#allocation3]   ;;  %s1175_s28 = scalar_lea.hbm %s1432_s1, 1536 }
   0x3   :  { %s22_s25 = sshll.u32 %s1247_s24, 4  ;;  %p1176_p0 = scmp.ne.s32.totalorder %s1432_s1, %s1175_s28  ;;  %s23_s25 = int_to_ptr.vmem [resolvable:$true] %s22_s25 }
   0x4   :  { %p1179_p1 = scmp.lt.u32.totalorder %s1175_s28, %s1432_s1 }
   0x6   :  { %p1181_p2 = pnand %p1179_p1, %p1176_p0 }
   0x8   :  { %1184 = shalt.err (!%p1181_p2)
}
   0x9   :  { %s1185_s10 = scalar_lea.vmem %s23_s25, 1536  ;;  %p1190_p4 = scmp.lt.s32.totalorder %s23_s25, %s23_s25 }
   0xa   :  { %p1186_p3 = scmp.ne.s32.totalorder %s23_s25, %s1185_s10  ;;  %p1191_p5 = scmp.lt.s32.totalorder %s1185_s10, %s1185_s10 }
   0xc   :  { %p1192_p6 = por %p1191_p5, %p1190_p4 }
   0xe   :  { %p1193_p7 = pnand %p1192_p6, %p1186_p3 }
  0x10   :  { %1196 = shalt.err (!%p1193_p7)
}
  0x11   :  { %s1248_s11 = smov 64   ;;  %s1249_s12 = smov 4  }
  0x12   :  { %28 = dma.hbm_to_vmem [thread:$0]  %s1432_s1, 1536, %s23_s25, [#allocation4], %s1248_s11, %s1248_s11, %s1249_s12  }
  0x13   :  { %s1250_s15 = smov [#allocation6]   ;;  %s1197_s19 = scalar_lea.hbm %s1433_s2, 3072 }
  0x14   :  { %s34_s16 = sshll.u32 %s1250_s15, 4  ;;  %p1198_p8 = scmp.ne.s32.totalorder %s1433_s2, %s1197_s19  ;;  %s35_s16 = int_to_ptr.vmem [resolvable:$true] %s34_s16 }
  0x15   :  { %p1201_p9 = scmp.lt.u32.totalorder %s1197_s19, %s1433_s2 }
  0x17   :  { %p1203_p10 = pnand %p1201_p9, %p1198_p8 }
  0x19   :  { %1206 = shalt.err (!%p1203_p10)
}
  0x1a   :  { %s1207_s24 = scalar_lea.vmem %s35_s16, 3072  ;;  %p1212_p12 = scmp.lt.s32.totalorder %s35_s16, %s35_s16 }
  0x1b   :  { %p1208_p11 = scmp.ne.s32.totalorder %s35_s16, %s1207_s24  ;;  %p1213_p13 = scmp.lt.s32.totalorder %s1207_s24, %s1207_s24 }
  0x1d   :  { %p1214_p0 = por %p1213_p13, %p1212_p12 }
  0x1f   :  { %p1215_p1 = pnand %p1214_p0, %p1208_p11 }
  0x21   :  { %1218 = shalt.err (!%p1215_p1)
}
  0x22   :  { %40 = dma.hbm_to_vmem [thread:$0]  %s1433_s2, 3072, %s35_s16, [#allocation7], %s1248_s11, %s1248_s11, %s1249_s12  }
  0x23   :  { %1241 = dma.done.wait [#allocation4], 1536  }
  0x24   :  { %1242 = vsyncadd [#allocation4], 4294965760 }
  0x25   :  { %1243 = dma.done.wait [#allocation7], 3072  }
  0x26   :  { %1244 = vsyncadd [#allocation7], 4294964224  ;;  %v1137_v0 = vld [vmem:[#allocation3 + $0x20] sm:$0xff]   ;;  %v1138_v1 = vld [vmem:[#allocation3 + $0x28] sm:$0xff]   ;;  %vm70_vm0 = vsmask.f32 3328 }
  0x27   :  { %1017 = vmatprep.subr.bf16.mxu0 %v1137_v0  ;;  %v1139_v2 = vld [vmem:[#allocation3 + $0x30] sm:$0xff]   ;;  %v1332_v5 = vld [vmem:[%s1431_s0 + $0x8] sm:$0x1]  ;;  %vm71_vm1 = vsmask.f32 7440  ;;  %vm160_vm3 = vcmask 523264  }
  0x28   :  { %1018 = vmatpush3.bf16.msra.mxu0 %v1137_v0  ;;  %v1322_v3 = vld [vmem:[%s1431_s0] sm:$0xf]  ;;  %v1327_v4 = vld [vmem:[%s1431_s0 + $0x4] sm:$0xf]  ;;  %v1140_v10 = vld [vmem:[#allocation3 + $0x38] sm:$0xff]   ;;  %v93_v11 = vshll.u32 %v1332_v5, 16 }
  0x29   :  { %1019 = vmatprep.subr.bf16.mxu0 %v1138_v1  ;;  %v74_v6 = vshrl.u32 %v1322_v3, 16  ;;  %v77_v7 = vshll.u32 %v1322_v3, 16  ;;  %v83_v8 = vshll.u32 %v1327_v4, 16  ;;  %v87_v9 = vshrl.u32 %v1327_v4, 16  ;;  %v1342_v16 = vld [vmem:[%s1431_s0 + $0xc] sm:$0xf]  ;;  %vm1359_vm2 = vmor %vm70_vm0, %vm71_vm1 }
  0x2a   :  { %v95_v17 = vrot.slane %v93_v11, 5  ;;  %v1347_v18 = vld [vmem:[%s1431_s0 + $0x10] sm:$0xf]  ;;  %v1352_v19 = vld [vmem:[%s1431_s0 + $0x14] sm:$0x1]  ;;  %v98_v20 = vshrl.u32 %v1342_v16, 16  ;;  %v923_v46 = vcombine.low %v1322_v3, %v1327_v4 }
  0x2b   :  { %v76_v12 = vrot.slane %v74_v6, 4  ;;  %v79_v13 = vrot.slane %v77_v7, 5  ;;  %v85_v14 = vrot.slane %v83_v8, 5  ;;  %v89_v15 = vrot.slane %v87_v9, 4  ;;  %v1141_v33 = vld [vmem:[#allocation3] sm:$0xff]   ;;  %v1142_v45 = vld [vmem:[#allocation3 + $0x8] sm:$0xff]  }
  0x2c   :  { %1020 = vmatpush3.bf16.msra.mxu0 %v1138_v1  ;;  %v101_v23 = vshll.u32 %v1342_v16, 16  ;;  %v107_v24 = vshll.u32 %v1347_v18, 16  ;;  %v100_v26 = vrot.slane %v98_v20, 4  ;;  %v111_v27 = vshrl.u32 %v1347_v18, 16  ;;  %v305_v49 = vld [vmem:[%s1431_s0] sm:$0xe] }
  0x2d   :  { %1021 = vmatprep.subr.bf16.mxu0 %v1139_v2  ;;  %v80_v21 = vor.u32 %v79_v13, %v76_v12  ;;  %v90_v22 = vor.u32 %v89_v15, %v85_v14  ;;  %v117_v28 = vshll.u32 %v1352_v19, 16  ;;  %vm311_vm4 = vcmask 1042432   ;;  %v1153_v52 = vld [vmem:[#allocation6] sm:$0xff]   ;;  %v1143_v53 = vld [vmem:[#allocation3 + $0x10] sm:$0xff]   ;;  %v1155_v56 = vld [vmem:[#allocation6 + $0x8] sm:$0xff]   ;;  %s1252_s23 = smov [#allocation8]  }
  0x2e   :  { %v103_v31 = vrot.slane %v101_v23, 5  ;;  %v109_v32 = vrot.slane %v107_v24, 5  ;;  %v113_v34 = vrot.slane %v111_v27, 4  ;;  %vm312_vm5 = vcmask 1046532   ;;  %1073 = vmatprep.subr.bf16.mxu1 %v1153_v52  ;;  %v1144_v57 = vld [vmem:[#allocation3 + $0x18] sm:$0xff]   ;;  %v1146_v58 = vld [vmem:[#allocation3 + $0x40] sm:$0xff]  }
  0x2f   :  { %v81_v29 = vrot.slane %v80_v21, 4  ;;  %v91_v30 = vrot.slane %v90_v22, 4  ;;  %v119_v40 = vrot.slane %v117_v28, 5  ;;  %v316_v47 = vrot.slane %v1327_v4, 5  ;;  %vm1380_vm6 = vmor %vm311_vm4, %vm312_vm5  ;;  %1074 = vmatpush3.bf16.msra.mxu1 %v1153_v52  ;;  %v1148_v62 = vld [vmem:[#allocation3 + $0x48] sm:$0xff]   ;;  %v1149_v1 = vld [vmem:[#allocation3 + $0x50] sm:$0xff]  }
  0x30   :  { %1022 = vmatpush3.bf16.msra.mxu0 %v1139_v2  ;;  %v104_v37 = vor.u32 %v103_v31, %v100_v26  ;;  %v114_v39 = vor.u32 %v113_v34, %v109_v32  ;;  %v319_v51 = vrot.slane %v1332_v5, 5  ;;  %v931_v55 = vrot.slane %v305_v49, 9  ;;  %1075 = vmatprep.subr.bf16.mxu1 %v1155_v56  ;;  %v306_v2 = vld [vmem:[%s1431_s0 + $0xc] sm:$0xe]  ;;  %v1151_v9 = vld [vmem:[#allocation6 + $0x40] sm:$0xff]   ;;  %v1152_v11 = vld [vmem:[#allocation6 + $0x48] sm:$0xff]  }
  0x31   :  { %1023 = vmatprep.subr.bf16.mxu0 %v1140_v10  ;;  %v86_v35 = vsel %vm1359_vm2, %v81_v29, %v85_v14  ;;  %v96_v36 = vsel %vm1359_vm2, %v91_v30, %v95_v17  ;;  %v318_v54 = vrot.slane %v316_v47, 4  ;;  %v924_v61 = vcombine.low %v1342_v16, %v1347_v18  ;;  %v1150_v6 = vld [vmem:[#allocation3 + $0x58] sm:$0xff]   ;;  %v1154_v12 = vld [vmem:[#allocation6 + $0x50] sm:$0xff]   ;;  %v1158_v15 = vld [vmem:[#allocation6 + $0x60] sm:$0xff]   ;;  %s902_s24 = sshll.u32 %s1252_s23, 4  ;;  %s903_s24 = int_to_ptr.vmem [resolvable:$true] %s902_s24 }
  0x32   :  { %v915_v38 = vcombine.low %v86_v35, %v96_v36  ;;  %v105_v41 = vrot.slane %v104_v37, 4  ;;  %v115_v42 = vrot.slane %v114_v39, 4  ;;  %v317_v59 = vsel %vm1380_vm6, %v931_v55, %v316_v47  ;;  %v1156_v13 = vld [vmem:[#allocation6 + $0x58] sm:$0xff]   ;;  %v1157_v14 = vld [vmem:[#allocation6 + $0x10] sm:$0xff]   ;;  %v1160_v17 = vld [vmem:[#allocation6 + $0x68] sm:$0xff]   ;;  %p1224_p3 = scmp.lt.s32.totalorder %s903_s24, %s903_s24 }
  0x33   :  { %1076 = vmatpush3.bf16.msra.mxu1 %v1155_v56  ;;  %v320_v60 = vsel %vm1380_vm6, %v318_v54, %v319_v51  ;;  %v323_v0 = vrot.slane %v1347_v18, 5  ;;  %v326_v3 = vrot.slane %v1352_v19, 5  ;;  %v932_v4 = vrot.slane %v306_v2, 9  ;;  %v1159_v16 = vld [vmem:[#allocation6 + $0x18] sm:$0xff]   ;;  %v1161_v18 = vld [vmem:[#allocation6 + $0x20] sm:$0xff]   ;;  %v1162_v19 = vld [vmem:[#allocation6 + $0x70] sm:$0xff]  }
  0x34   :  { %1024 = vmatpush3.bf16.msra.mxu0 %v1140_v10  ;;  %1025 = vmatprep.mubr.msk.bf16.mxu0 %vm160_vm3, %v915_v38  ;;  %v110_v43 = vsel %vm1359_vm2, %v105_v41, %v109_v32  ;;  %v120_v44 = vsel %vm1359_vm2, %v115_v42, %v119_v40  ;;  %v933_v63 = vcombine.low %v317_v59, %v320_v60  ;;  %v1163_v20 = vld [vmem:[#allocation6 + $0x28] sm:$0xff]   ;;  %v1251_v21 = vmov 0   ;;  %v1164_v22 = vld [vmem:[#allocation6 + $0x78] sm:$0xff]   ;;  %v1165_v23 = vld [vmem:[#allocation6 + $0x30] sm:$0xff]  }
  0x35   :  { %1029 = vmatprep.subr.bf16.mxu0 %v1141_v33  ;;  %v916_v48 = vcombine.low %v110_v43, %v120_v44  ;;  %v325_v5 = vrot.slane %v323_v0, 4  ;;  %v324_v7 = vsel %vm1380_vm6, %v932_v4, %v323_v0  ;;  %1077 = vmatprep.subr.bf16.mxu1 %v1157_v14  ;;  %452 = vst [vmem:[#allocation2] sm:$0xff] %v1251_v21  ;;  %453 = vst [vmem:[#allocation2 + $0x18] sm:$0xff] %v1251_v21  ;;  %v1166_v24 = vld [vmem:[#allocation6 + $0x38] sm:$0xff]   ;;  %v1167_v25 = vld [vmem:[#allocation6 + $0x80] sm:$0xff]  }
  0x36   :  { %454 = vst [vmem:[#allocation2 + $0x10] sm:$0xff] %v1251_v21  ;;  %455 = vst [vmem:[#allocation2 + $0x28] sm:$0xff] %v1251_v21  ;;  %v941_v26 = vld [vmem:[%s1434_s3] ss:$0 sm:$0xff]  ;;  %vm464_vm7 = vsmask.f32 256 }
  0x37   :  { %1026 = vmatmul.mubr.msk.bf16.vlgmr.msra.gmra.mrb[0].mxu0 %vm160_vm3, %v916_v48  ;;  %v327_v8 = vsel %vm1380_vm6, %v325_v5, %v326_v3  ;;  %1078 = vmatpush3.bf16.msra.mxu1 %v1157_v14  ;;  %v942_v28 = vld [vmem:[%s1435_s4] ss:$0 sm:$0xff]  ;;  %vm722_vm8 = vsmask.f32 7424  ;;  %v1168_v2 = vld [vmem:[#allocation6 + $0x88] sm:$0xff]  }
  0x38   :  { %1030 = vmatpush3.bf16.msra.mxu0 %v1141_v33  ;;  %1037 = vmatprep.mubr.msk.bf16.mxu0 %vm160_vm3, %v923_v46  ;;  %v934_v10 = vcombine.low %v324_v7, %v327_v8  ;;  %v1169_v5 = vld [vmem:[#allocation6 + $0x90] sm:$0xff]   ;;  %v1171_v7 = vld [vmem:[#allocation6 + $0xa0] sm:$0xff]   ;;  %v1172_v8 = vld [vmem:[#allocation6 + $0xa8] sm:$0xff]  }
  0x39   :  { %1031 = vmatprep.subr.bf16.mxu0 %v1142_v45  ;;  %1079 = vmatprep.subr.bf16.mxu1 %v1159_v16 }
  0x3b   :  { %1080 = vmatpush3.bf16.msra.mxu1 %v1159_v16 }
  0x3c   :  { %1032 = vmatpush3.bf16.msra.mxu0 %v1142_v45  ;;  %1081 = vmatprep.subr.bf16.mxu1 %v1161_v18  ;;  %v460_v42 = vld [vmem:[#allocation2] sm:$0x80]  ;;  %v462_v45 = vld [vmem:[#allocation2 + $0x18] sm:$0x80] }
  0x3d   :  { %1033 = vmatprep.subr.bf16.mxu0 %v1143_v53  ;;  %v719_v47 = vld [vmem:[#allocation2 + $0x10] sm:$0x1]  ;;  %v466_v49 = vshrl.u32 %v460_v42, 16  ;;  %v478_v51 = vshrl.u32 %v462_v45, 16 }
  0x3e   :  { %v731_v54 = vshll.u32 %v719_v47, 16 }
  0x3f   :  { %1082 = vmatpush3.bf16.msra.mxu1 %v1161_v18  ;;  %v480_v60 = vrot.slane %v478_v51, 7 }
  0x40   :  { %1034 = vmatpush3.bf16.msra.mxu0 %v1143_v53  ;;  %1083 = vmatprep.subr.bf16.mxu1 %v1163_v20  ;;  %v733_v0 = vrot.slane %v731_v54, 1 }
  0x41   :  { %1035 = vmatprep.subr.bf16.mxu0 %v1144_v57 }
  0x43   :  { %1084 = vmatpush3.bf16.msra.mxu1 %v1163_v20 }
  0x44   :  { %1036 = vmatpush3.bf16.msra.mxu0 %v1144_v57  ;;  %1085 = vmatprep.subr.bf16.mxu1 %v1165_v23 }
  0x45   :  { %1041 = vmatprep.subr.bf16.mxu0 %v1146_v58 }
  0x47   :  { %1038 = vmatmul.mubr.msk.bf16.vlgmr.msra.gmra.mrb[0].mxu0 %vm160_vm3, %v924_v61  ;;  %1086 = vmatpush3.bf16.msra.mxu1 %v1165_v23 }
  0x48   :  { %1042 = vmatpush3.bf16.msra.mxu0 %v1146_v58  ;;  %1049 = vmatprep.mubr.msk.bf16.mxu0 %vm160_vm3, %v933_v63  ;;  %v468_v58 = vrot.slane %v466_v49, 7 }
  0x49   :  { %1043 = vmatprep.subr.bf16.mxu0 %v1148_v62  ;;  %1087 = vmatprep.subr.bf16.mxu1 %v1166_v24 }
  0x4b   :  { %1088 = vmatpush3.bf16.msra.mxu1 %v1166_v24 }
  0x4c   :  { %1044 = vmatpush3.bf16.msra.mxu0 %v1148_v62  ;;  %1093 = vmatprep.subr.bf16.mxu1 %v1167_v25 }
  0x4d   :  { %1045 = vmatprep.subr.bf16.mxu0 %v1149_v1 }
  0x50   :  { %1046 = vmatpush3.bf16.msra.mxu0 %v1149_v1 }
  0x51   :  { %1047 = vmatprep.subr.bf16.mxu0 %v1150_v6 }
  0x54   :  { %1048 = vmatpush3.bf16.msra.mxu0 %v1150_v6  ;;  %v1170_v6 = vld [vmem:[#allocation6 + $0x98] sm:$0xff]  }
  0x55   :  { %1053 = vmatprep.subr.bf16.mxu0 %v1151_v9 }
  0x57   :  { %1050 = vmatmul.mubr.msk.bf16.vlgmr.msra.gmra.mrb[0].mxu0 %vm160_vm3, %v934_v10  ;;  %v721_v10 = vld [vmem:[#allocation2 + $0x28] sm:$0x1] }
  0x58   :  { %1054 = vmatpush3.bf16.msra.mxu0 %v1151_v9  ;;  %v1173_v9 = vld [vmem:[#allocation6 + $0xb0] sm:$0xff]  }
  0x59   :  { %1055 = vmatprep.subr.bf16.mxu0 %v1152_v11 }
  0x5c   :  { %1056 = vmatpush3.bf16.msra.mxu0 %v1152_v11  ;;  %v1174_v11 = vld [vmem:[#allocation6 + $0xb8] sm:$0xff]  }
  0x5d   :  { %1057 = vmatprep.subr.bf16.mxu0 %v1154_v12 }
  0x60   :  { %1058 = vmatpush3.bf16.msra.mxu0 %v1154_v12 }
  0x61   :  { %1059 = vmatprep.subr.bf16.mxu0 %v1156_v13 }
  0x64   :  { %1060 = vmatpush3.bf16.msra.mxu0 %v1156_v13  ;;  %v743_v13 = vshll.u32 %v721_v10, 16 }
  0x65   :  { %1061 = vmatprep.subr.bf16.mxu0 %v1158_v15 }
  0x68   :  { %1062 = vmatpush3.bf16.msra.mxu0 %v1158_v15  ;;  %v745_v15 = vrot.slane %v743_v13, 1 }
  0x69   :  { %1063 = vmatprep.subr.bf16.mxu0 %v1160_v17 }
  0x6c   :  { %1064 = vmatpush3.bf16.msra.mxu0 %v1160_v17 }
  0x6d   :  { %1065 = vmatprep.subr.bf16.mxu0 %v1162_v19 }
  0x70   :  { %1066 = vmatpush3.bf16.msra.mxu0 %v1162_v19 }
  0x71   :  { %1067 = vmatprep.subr.bf16.mxu0 %v1164_v22 }
  0x74   :  { %1068 = vmatpush3.bf16.msra.mxu0 %v1164_v22  ;;  %v967_v22 = vld [vmem:[%s1436_s5] ss:$0 sm:$0xff]  ;;  %s1219_s5 = scalar_lea.vmem %s903_s24, 512 }
  0x75   :  { %p1220_p2 = scmp.ne.s32.totalorder %s903_s24, %s1219_s5  ;;  %p1225_p4 = scmp.lt.s32.totalorder %s1219_s5, %s1219_s5 }
  0x77   :  { %p1226_p5 = por %p1225_p4, %p1224_p3 }
  0x79   :  { %p1227_p6 = pnand %p1226_p5, %p1220_p2 }
 0x12a   :  { %v1051_v27 = vpop.f32.mrb[0].mxu0 }
 0x12b   :  { %v435_v29 = vmul.f32 %v1051_v27, %v941_v26  ;;  %v407_v30 = vpop.f32.mrb[1].mxu0 }
 0x12c   :  { %v433_v31 = vmul.f32 %v941_v26, %v407_v30  ;;  %v1052_v32 = vpop.f32.mrb[2].mxu0 }
 0x12d   :  { %v446_v33 = vadd.f32 %v942_v28, %v435_v29  ;;  %v436_v34 = vmul.f32 %v1052_v32, %v941_v26  ;;  %v410_v35 = vpop.f32.mrb[3].mxu0 }
 0x12e   :  { %v444_v36 = vadd.f32 %v942_v28, %v433_v31  ;;  %v434_v37 = vmul.f32 %v941_v26, %v410_v35 }
 0x12f   :  { %v447_v38 = vadd.f32 %v942_v28, %v436_v34  ;;  %v450_v40 = vmax.f32 %v446_v33, 0.0 }
 0x130   :  { %v445_v39 = vadd.f32 %v942_v28, %v434_v37  ;;  %v448_v43 = vmax.f32 %v444_v36, 0.0 }
 0x131   :  { %v451_v41 = vmax.f32 %v447_v38, 0.0 }
 0x132   :  { %v449_v44 = vmax.f32 %v445_v39, 0.0 }
 0x133   :  { %v457_v46 = vpack.c.bf16 %v451_v41, %v450_v40 }
 0x134   :  { %v456_v48 = vpack.c.bf16 %v449_v44, %v448_v43 }
 0x135   :  { %v482_v50 = vshrl.u32 %v457_v46, 16  ;;  %v485_v56 = vshll.u32 %v457_v46, 16 }
 0x136   :  { %v470_v52 = vshrl.u32 %v456_v48, 16  ;;  %v473_v53 = vshll.u32 %v456_v48, 16  ;;  %1069 = vmatprep.mubr.bf16.mxu0 %v456_v48 }
 0x137   :  { %v484_v55 = vrot.slane %v482_v50, 7  ;;  %1070 = vmatmul.mubr.bf16.vlgmr.msra.gmra.mrb[4].mxu0 %v457_v46  ;;  %v740_v12 = vrot.slane %v485_v56, 1 }
 0x138   :  { %v472_v57 = vrot.slane %v470_v52, 7  ;;  %v728_v59 = vrot.slane %v473_v53, 1 }
 0x139   :  { %v487_v61 = vor.u32 %v485_v56, %v484_v55  ;;  %v741_v14 = vor.u32 %v740_v12, %v482_v50 }
 0x13a   :  { %v475_v62 = vor.u32 %v473_v53, %v472_v57  ;;  %v729_v63 = vor.u32 %v728_v59, %v470_v52 }
 0x13b   :  { %v488_v3 = vsel %vm464_vm7, %v480_v60, %v487_v61  ;;  %v746_v16 = vsel %vm722_vm8, %v741_v14, %v745_v15 }
 0x13c   :  { %v476_v1 = vsel %vm464_vm7, %v468_v58, %v475_v62  ;;  %v734_v4 = vsel %vm722_vm8, %v729_v63, %v733_v0 }
 0x13d   :  { %1089 = vmatprep.mubr.bf16.mxu1 %v476_v1 }
 0x13e   :  { %1090 = vmatmul.mubr.bf16.vlgmr.msra.gmra.mrb[0].mxu1 %v488_v3 }
 0x13f   :  { %1094 = vmatpush3.bf16.msra.mxu1 %v1167_v25  ;;  %1109 = vmatprep.mubr.bf16.mxu1 %v734_v4  ;;  %v968_v25 = vld [vmem:[%s1437_s6] ss:$0 sm:$0xff] }
 0x140   :  { %1095 = vmatprep.subr.bf16.mxu1 %v1168_v2 }
 0x143   :  { %1096 = vmatpush3.bf16.msra.mxu1 %v1168_v2 }
 0x144   :  { %1097 = vmatprep.subr.bf16.mxu1 %v1169_v5 }
 0x147   :  { %1098 = vmatpush3.bf16.msra.mxu1 %v1169_v5 }
 0x148   :  { %1099 = vmatprep.subr.bf16.mxu1 %v1170_v6 }
 0x14b   :  { %1100 = vmatpush3.bf16.msra.mxu1 %v1170_v6 }
 0x14c   :  { %1101 = vmatprep.subr.bf16.mxu1 %v1171_v7 }
 0x14f   :  { %1102 = vmatpush3.bf16.msra.mxu1 %v1171_v7 }
 0x150   :  { %1103 = vmatprep.subr.bf16.mxu1 %v1172_v8 }
 0x153   :  { %1104 = vmatpush3.bf16.msra.mxu1 %v1172_v8 }
 0x154   :  { %1105 = vmatprep.subr.bf16.mxu1 %v1173_v9 }
 0x157   :  { %1106 = vmatpush3.bf16.msra.mxu1 %v1173_v9 }
 0x158   :  { %1107 = vmatprep.subr.bf16.mxu1 %v1174_v11 }
 0x15b   :  { %1108 = vmatpush3.bf16.msra.mxu1 %v1174_v11 }
 0x15e   :  { %1110 = vmatmul.mubr.bf16.vlgmr.msra.gmra.mrb[0].mxu1 %v746_v16 }
 0x20a   :  { %v1071_v17 = vpop.f32.mrb[4].mxu0 }
 0x20b   :  { %v606_v18 = vpop.f32.mrb[5].mxu0 }
 0x20c   :  { %v1072_v19 = vpop.f32.mrb[6].mxu0 }
 0x20d   :  { %v609_v20 = vpop.f32.mrb[7].mxu0 }
 0x231   :  { %v1111_v21 = vpop.f32.mrb[0].mxu1 }
 0x232   :  { %v1113_v23 = vadd.f32 %v1111_v21, %v1071_v17  ;;  %v848_v24 = vpop.f32.mrb[1].mxu1 }
 0x233   :  { %v1114_v26 = vadd.f32 %v848_v24, %v606_v18  ;;  %v1112_v27 = vpop.f32.mrb[2].mxu1 }
 0x234   :  { %v876_v28 = vmul.f32 %v1113_v23, %v967_v22  ;;  %v1115_v29 = vadd.f32 %v1112_v27, %v1072_v19  ;;  %v851_v30 = vpop.f32.mrb[3].mxu1 }
 0x235   :  { %v874_v31 = vmul.f32 %v1114_v26, %v967_v22  ;;  %v1116_v32 = vadd.f32 %v851_v30, %v609_v20 }
 0x236   :  { %v887_v33 = vadd.f32 %v968_v25, %v876_v28  ;;  %v877_v34 = vmul.f32 %v1115_v29, %v967_v22 }
 0x237   :  { %v885_v35 = vadd.f32 %v968_v25, %v874_v31  ;;  %v875_v36 = vmul.f32 %v1116_v32, %v967_v22 }
 0x238   :  { %v891_v37 = vmax.f32 %v887_v33, 0.0  ;;  %v888_v38 = vadd.f32 %v968_v25, %v877_v34 }
 0x239   :  { %v889_v39 = vmax.f32 %v885_v35, 0.0  ;;  %v886_v40 = vadd.f32 %v968_v25, %v875_v36 }
 0x23a   :  { %895 = vst [vmem:[#allocation8 + $0x10] sm:$0xff] %v891_v37  ;;  %v892_v41 = vmax.f32 %v888_v38, 0.0 }
 0x23b   :  { %893 = vst [vmem:[#allocation8] sm:$0xff] %v889_v39  ;;  %v890_v42 = vmax.f32 %v886_v40, 0.0 }
 0x23c   :  { %896 = vst [vmem:[#allocation8 + $0x18] sm:$0xff] %v892_v41 }
 0x23d   :  { %894 = vst [vmem:[#allocation8 + $0x8] sm:$0xff] %v890_v42 }
 0x23e   :  { %1230 = shalt.err (!%p1227_p6)
}
 0x23f   :  { %s1231_s25 = scalar_lea.hbm %s1438_s7, 512 }
 0x240   :  { %p1232_p7 = scmp.ne.s32.totalorder %s1438_s7, %s1231_s25  ;;  %p1235_p8 = scmp.lt.u32.totalorder %s1231_s25, %s1438_s7 }
 0x242   :  { %p1237_p9 = pnand %p1235_p8, %p1232_p7 }
 0x244   :  { %1240 = shalt.err (!%p1237_p9)
}
 0x245   :  { %s1253_s2 = smov 128   ;;  %s1254_s30 = smov 8  }
 0x246   :  { %908 = dma.vmem_to_hbm [thread:$0]  %s903_s24, 512, %s1438_s7, [#allocation5], %s1253_s2, %s1253_s2, %s1254_s30  }
 0x247   :  { %1245 = dma.done.wait [#allocation5], 512  }
 0x248   :  { %1246 = vsyncadd [#allocation5], 4294966784 }
 0x249   :  { %912 = vsyncpa [#allocation4], 1 }
 0x24a   :  { %913 = vsyncpa [#allocation7], 1 }
 0x24b   :  { %914 = vsyncpa [#allocation5], 1 }

</bundles_post_ra>
